<compile_context>
chip_gen: v7x
topology: tpu7x:2x2x1
jax: 0.10.0
libtpu: 0.0.40
codegen_flags: <defaults>
</compile_context>

<pallas_src>
import jax
import jax.numpy as jnp
from jax.experimental import pallas as pl
from jax.experimental.pallas import tpu as pltpu

LEAKY_SLOPE = 0.01  # torch.nn.LeakyReLU default negative_slope


def _global_dense_decoder_kernel(x_ref, w_ref, b_ref, o_ref):
    # Hot path: matmul on the MXU, bias add + LeakyReLU on the VPU.
    y = jnp.dot(x_ref[...], w_ref[...], preferred_element_type=jnp.float32)
    y = y + b_ref[...]  # (B, TN) + (1, TN) broadcast
    o_ref[...] = jnp.where(y >= 0, y, LEAKY_SLOPE * y).astype(o_ref.dtype)


# ----------------------------------------------------------------------------
# Per-generation policy: (double-buffered working-set budget, vmem_limit cap).
# v5e : ~0.82 TB/s HBM, 16 MiB scoped default   -> ~14 MiB working set is enough.
# v6e : ~1.4 TB/s HBM, 128 MiB physical VMEM    -> ~48 MiB working set.
# v7x : ~3.2 TB/s HBM, but only 64 MiB physical -> ~28 MiB working set.
# ----------------------------------------------------------------------------
_BUDGETS = {
    "v5e": (14 << 20, 96 << 20),
    "v6e": (48 << 20, 112 << 20),
    "v7x": (28 << 20, 56 << 20),
    "unknown": (24 << 20, 64 << 20),
}


def _tpu_generation():
    try:
        kind = jax.devices()[0].device_kind.lower()
    except Exception:  # e.g. interpret mode / no device
        return "unknown"
    if "7" in kind:
        return "v7x"
    if "v6" in kind:
        return "v6e"
    if "v5e" in kind or "v5 lite" in kind or "v5litepod" in kind:
        return "v5e"
    return "unknown"


def _dim_semantics(gen, n_steps):
    # Only CORE_PARALLEL actually changes codegen; on v7x (2 TCs/chip) it splits
    # the weight DMA stream across both cores.  Plain "parallel" elsewhere.
    if gen == "v7x" and n_steps >= 2 and hasattr(pltpu, "CORE_PARALLEL"):
        return (pltpu.CORE_PARALLEL,)
    return ("parallel",)


def _choose_tn(F_pad, G, B, w_bytes, out_bytes, b_bytes, x_bytes,
               budget_bytes, cap=16384, n_weight_buffers=2):
    """Pick a lane-aligned (multiple-of-128) F tile whose FULL double-buffered
    working set (weight + output + bias + resident x) fits the budget."""
    per_col = (n_weight_buffers * G * w_bytes      # weight stream
               + 2 * B * out_bytes                 # output stream
               + 2 * b_bytes)                      # bias stream
    avail = max(budget_bytes - 2 * B * G * x_bytes, per_col * 128)
    tn = (avail // per_col // 128) * 128
    tn = max(128, min(tn, (cap // 128) * 128, F_pad))
    return int(tn)


def global_dense_decoder(global_vector, weight_t, bias, seq_length, hidden_size,
                         *, tn=None, weight_dtype=None, out_dtype=jnp.float32,
                         weight_buffers=None):
    """global_vector: (B, global_dim), weight_t: (global_dim, seq*hidden),
    bias: (seq*hidden,). Returns (B, seq_length, hidden_size) in out_dtype."""
    B, G = global_vector.shape
    F = seq_length * hidden_size
    assert weight_t.shape == (G, F), (weight_t.shape, (G, F))
    assert bias.shape == (F,), bias.shape

    # Optional weight streaming dtype (e.g. bf16): halves the HBM-bound weight
    # bytes; matmul accumulates in f32 via preferred_element_type.  Cast x too so
    # the MXU sees the classic bf16 x bf16 -> f32 path; bias stays f32.
    if weight_dtype is not None and weight_t.dtype != jnp.dtype(weight_dtype):
        weight_t = weight_t.astype(weight_dtype)
        global_vector = global_vector.astype(weight_dtype)

    # Zero-pad F up to a lane multiple so every tile stays 128-aligned and
    # lane-dense.  (In a real model the padded weight would be built once, not
    # per call.)
    F_pad = ((F + 127) // 128) * 128
    if F_pad != F:
        weight_t = jnp.pad(weight_t, ((0, 0), (0, F_pad - F)))
        bias = jnp.pad(bias, (0, F_pad - F))
    bias2d = bias.reshape(1, F_pad).astype(jnp.float32)

    w_bytes = jnp.dtype(weight_t.dtype).itemsize
    x_bytes = jnp.dtype(global_vector.dtype).itemsize
    out_bytes = jnp.dtype(out_dtype).itemsize
    b_bytes = 4

    n_wbuf = int(weight_buffers) if (weight_buffers and weight_buffers > 2) else 2

    gen = _tpu_generation()
    budget_bytes, vmem_cap = _BUDGETS.get(gen, _BUDGETS["unknown"])

    if tn is None:
        tn = _choose_tn(F_pad, G, B, w_bytes, out_bytes, b_bytes, x_bytes,
                        budget_bytes, n_weight_buffers=n_wbuf)
    assert tn % 128 == 0 and 0 < tn <= F_pad, f"bad tile {tn} for F_pad={F_pad}"

    # Non-dividing tiles are fine: the final grid step is a ragged/masked block.
    n_steps = pl.cdiv(F_pad, tn)

    # Explicit VMEM limit covering the chosen working set (+ headroom), so the
    # compiler accepts tiles larger than the 16/32 MiB scoped defaults.
    working_set = (n_wbuf * G * tn * w_bytes
                   + 2 * B * tn * out_bytes
                   + 2 * tn * b_bytes
                   + 2 * B * G * x_bytes)
    vmem_limit = int(min(vmem_cap,
                         max(32 << 20, int(working_set * 1.25) + (4 << 20))))

    w_spec_kwargs = {}
    if n_wbuf > 2:
        # Extra weight buffering to absorb DMA issue jitter on many-step grids.
        w_spec_kwargs["pipeline_mode"] = pl.Buffered(n_wbuf)

    cost = pl.CostEstimate(
        flops=2 * B * G * F_pad,
        transcendentals=0,
        bytes_accessed=(G * F_pad * w_bytes + B * G * x_bytes
                        + F_pad * b_bytes + B * F_pad * out_bytes),
    )

    out = pl.pallas_call(
        _global_dense_decoder_kernel,
        out_shape=jax.ShapeDtypeStruct((B, F_pad), out_dtype),
        grid=(n_steps,),
        in_specs=[
            # x is small and identical for every tile: stays resident in VMEM.
            pl.BlockSpec((B, G), lambda j: (0, 0)),
            # Weight and bias stream tile-by-tile along F (double-buffered DMA).
            pl.BlockSpec((G, tn), lambda j: (0, j), **w_spec_kwargs),
            pl.BlockSpec((1, tn), lambda j: (0, j)),
        ],
        out_specs=pl.BlockSpec((B, tn), lambda j: (0, j)),
        compiler_params=pltpu.CompilerParams(
            dimension_semantics=_dim_semantics(gen, n_steps),
            vmem_limit_bytes=vmem_limit,
        ),
        cost_estimate=cost,
    )(global_vector, weight_t, bias2d)

    if F_pad != F:
        out = out[:, :F]
    return out.reshape(B, seq_length, hidden_size)


# ----------------------------------------------------------------------------
# Reference + tests
# ----------------------------------------------------------------------------
def _reference(global_vector, weight_t, bias, seq_length, hidden_size):
    y = global_vector.astype(jnp.float32) @ weight_t.astype(jnp.float32) + bias
    y = jnp.where(y >= 0, y, LEAKY_SLOPE * y)
    return y.reshape(global_vector.shape[0], seq_length, hidden_size)


def _make_case(key, batch, global_dim, seq_length, hidden_size):
    k_x, k_w, k_b = jax.random.split(key, 3)
    F = seq_length * hidden_size
    bound = 1.0 / jnp.sqrt(jnp.float32(global_dim))
    # torch Linear weight is (out_features, in_features); store transposed for x @ W.
    weight = jax.random.uniform(k_w, (F, global_dim), jnp.float32, -bound, bound)
    bias = jax.random.uniform(k_b, (F,), jnp.float32, -bound, bound)
    x = jax.random.normal(k_x, (batch, global_dim), jnp.float32)
    return x, weight.T, bias


if __name__ == "__main__":
    key = jax.random.PRNGKey(0)
    k1, k2, k3 = jax.random.split(key, 3)

    # Case 1: small shape consistent with the module (batch=2, global_dim=32,
    # seq=8, hidden=32 -> F=256), auto-chosen tile.
    x, wt, b = _make_case(k1, batch=2, global_dim=32, seq_length=8, hidden_size=32)
    ref = _reference(x, wt, b, 8, 32)
    out = jax.block_until_ready(global_dense_decoder(x, wt, b, 8, 32))
    assert out.shape == (2, 8, 32)
    assert jnp.allclose(out, ref, atol=1e-5, rtol=1e-5)

    # Case 2: forced small tile -> multi-step pipelined grid path.
    out2 = jax.block_until_ready(global_dense_decoder(x, wt, b, 8, 32, tn=128))
    assert jnp.allclose(out2, ref, atol=1e-5, rtol=1e-5)

    # Case 3: non-dividing tile (F=384, tn=256) -> ragged/masked final block.
    x3, wt3, b3 = _make_case(k2, batch=2, global_dim=32, seq_length=3, hidden_size=128)
    ref3 = _reference(x3, wt3, b3, 3, 128)
    out3 = jax.block_until_ready(global_dense_decoder(x3, wt3, b3, 3, 128, tn=256))
    assert jnp.allclose(out3, ref3, atol=1e-5, rtol=1e-5)

    # Case 4: F not a multiple of 128 (F=120) -> zero-pad + slice path.
    x4, wt4, b4 = _make_case(k3, batch=2, global_dim=32, seq_length=5, hidden_size=24)
    ref4 = _reference(x4, wt4, b4, 5, 24)
    out4 = jax.block_until_ready(global_dense_decoder(x4, wt4, b4, 5, 24))
    assert out4.shape == (2, 5, 24)
    assert jnp.allclose(out4, ref4, atol=1e-5, rtol=1e-5)

    # Case 5: bf16 weight streaming (halves weight HBM bytes; f32 accumulation).
    out5 = jax.block_until_ready(
        global_dense_decoder(x, wt, b, 8, 32, weight_dtype=jnp.bfloat16))
    assert jnp.allclose(out5, ref, atol=3e-2, rtol=3e-2)

    print("KERNEL_OK")
</pallas_src>

<mosaic_0001>
module attributes {stable_mosaic.version = 11 : i64} {
  func.func @_global_dense_decoder_kernel(%arg0: i32, %arg1: memref<2x32xf32, #tpu.memory_space<vmem>>, %arg2: memref<32x256xf32, #tpu.memory_space<vmem>>, %arg3: memref<1x256xf32, #tpu.memory_space<vmem>>, %arg4: memref<2x256xf32, #tpu.memory_space<vmem>>) attributes {dimension_semantics = [#tpu.dimension_semantics<parallel>], iteration_bounds = array<i64: 1>, scalar_prefetch = 0 : i64, scratch_operands = 0 : i64, tpu.core_type = #tpu.core_type<tc>, window_params = [{pipeline_mode = #tpu.pipeline_mode<synchronous>, transform_indices = @transform_0, window_bounds = array<i64: 2, 32>}, {transform_indices = @transform_1, window_bounds = array<i64: 32, 256>}, {transform_indices = @transform_2, window_bounds = array<i64: 1, 256>}, {transform_indices = @transform_3, window_bounds = array<i64: 2, 256>}]} {
    %c0 = arith.constant 0 : index
    %c0_0 = arith.constant 0 : index
    %0 = vector.load %arg1[%c0, %c0_0] : memref<2x32xf32, #tpu.memory_space<vmem>>, vector<2x32xf32>
    %c0_1 = arith.constant 0 : index
    %c0_2 = arith.constant 0 : index
    %1 = vector.load %arg2[%c0_1, %c0_2] : memref<32x256xf32, #tpu.memory_space<vmem>>, vector<32x256xf32>
    %cst = arith.constant dense<0.000000e+00> : vector<2x256xf32>
    %2 = tpu.matmul %0, %1, %cst {dimension_numbers = #tpu.dot_dimension_numbers<[1], [0], [0], [1], [0, 0, 1, 1], [], []>} : vector<2x32xf32>, vector<32x256xf32>, vector<2x256xf32> -> vector<2x256xf32>
    %c0_3 = arith.constant 0 : index
    %c0_4 = arith.constant 0 : index
    %3 = vector.load %arg3[%c0_3, %c0_4] : memref<1x256xf32, #tpu.memory_space<vmem>>, vector<1x256xf32>
    %4 = vector.broadcast %3 : vector<1x256xf32> to vector<2x256xf32>
    %5 = arith.addf %2, %4 : vector<2x256xf32>
    %cst_5 = arith.constant 0.000000e+00 : f32
    %6 = vector.broadcast %cst_5 : f32 to vector<2x256xf32>
    %7 = arith.cmpf oge, %5, %6 : vector<2x256xf32>
    %cst_6 = arith.constant 0.00999999977 : f32
    %8 = vector.broadcast %cst_6 : f32 to vector<2x256xf32>
    %9 = arith.mulf %8, %5 : vector<2x256xf32>
    %10 = arith.select %7, %5, %9 : vector<2x256xi1>, vector<2x256xf32>
    %c0_7 = arith.constant 0 : index
    %c0_8 = arith.constant 0 : index
    %11 = vector.load %arg4[%c0_7, %c0_8] : memref<2x256xf32, #tpu.memory_space<vmem>>, vector<2x256xf32>
    tpu.vector_store %arg4[%c0_7, %c0_8], %10 {strides = array<i32>} : memref<2x256xf32, #tpu.memory_space<vmem>>, vector<2x256xf32>,
    return
  }
  func.func @transform_0(%arg0: i32) -> (i32, i32) {
    %c0_i32 = arith.constant 0 : i32
    %c0_i32_0 = arith.constant 0 : i32
    %c0_i32_1 = arith.constant 0 : i32
    return %c0_i32, %c0_i32_0 : i32, i32
  }
  func.func @transform_1(%arg0: i32) -> (i32, i32) {
    %c0_i32 = arith.constant 0 : i32
    %c0_i32_0 = arith.constant 0 : i32
    return %c0_i32, %arg0 : i32, i32
  }
  func.func @transform_2(%arg0: i32) -> (i32, i32) {
    %c0_i32 = arith.constant 0 : i32
    %c0_i32_0 = arith.constant 0 : i32
    return %c0_i32, %arg0 : i32, i32
  }
  func.func @transform_3(%arg0: i32) -> (i32, i32) {
    %c0_i32 = arith.constant 0 : i32
    %c0_i32_0 = arith.constant 0 : i32
    return %c0_i32, %arg0 : i32, i32
  }
}

</mosaic_0001>

<bundles_post_ra>
// kernel: tpu_custom_call.1
= control target key start
LH: loop header
LB: loop body
LE: loop exit
PB: predicated region body
PF: predicated region fallthrough
CT: control target
= control target key end

     0   :  { %8 = vsyncpa [#allocation3], 0  ;;  %s331_s0 = inlined_call_operand.hbm [shape: f32[2,32], index: 0, kind: input, shape index: {}]   ;;  %s332_s1 = inlined_call_operand.hbm [shape: f32[32,256], index: 1, kind: input, shape index: {}]   ;;  %s333_s2 = inlined_call_operand.vmem [shape: f32[1,256], index: 2, kind: input, shape index: {}]   ;;  %s334_s3 = inlined_call_operand.hbm [shape: f32[2,256], index: 3, kind: output, shape index: {}]  }
   0x1   :  { %9 = vsyncpa [#allocation6], 0 }
   0x2   :  { %10 = vsyncpa [#allocation4], 0  ;;  %s259_s12 = smov [#allocation2]   ;;  %s260_s14 = smov [#allocation5]  }
   0x3   :  { %s17_s13 = sshll.u32 %s259_s12, 4  ;;  %s26_s15 = sshll.u32 %s260_s14, 4  ;;  %s18_s13 = int_to_ptr.vmem [resolvable:$true] %s17_s13  ;;  %s285_s15 = int_to_ptr.vmem [resolvable:$true] %s26_s15 }
   0x4   :  { %s187_s18 = scalar_lea.hbm %s331_s0, 32 }
   0x5   :  { %p188_p0 = scmp.ne.s32.totalorder %s331_s0, %s187_s18  ;;  %p191_p1 = scmp.lt.u32.totalorder %s187_s18, %s331_s0 }
   0x7   :  { %p193_p2 = pnand %p191_p1, %p188_p0 }
   0x9   :  { %196 = shalt.err (!%p193_p2)
}
   0xa   :  { %s197_s23 = scalar_lea.vmem %s18_s13, 32  ;;  %p202_p4 = scmp.lt.s32.totalorder %s18_s13, %s18_s13 }
   0xb   :  { %p198_p3 = scmp.ne.s32.totalorder %s18_s13, %s197_s23  ;;  %p203_p5 = scmp.lt.s32.totalorder %s197_s23, %s197_s23 }
   0xd   :  { %p204_p6 = por %p203_p5, %p202_p4 }
   0xf   :  { %p205_p7 = pnand %p204_p6, %p198_p3 }
  0x11   :  { %208 = shalt.err (!%p205_p7)
}
  0x12   :  { %20 = dma.hbm_to_vmem [thread:$0]  %s331_s0, 32, %s18_s13, [#allocation3]  }
  0x13   :  { %s209_s28 = scalar_lea.hbm %s332_s1, 1024 }
  0x14   :  { %p210_p8 = scmp.ne.s32.totalorder %s332_s1, %s209_s28  ;;  %p213_p9 = scmp.lt.u32.totalorder %s209_s28, %s332_s1 }
  0x16   :  { %p215_p10 = pnand %p213_p9, %p210_p8 }
  0x18   :  { %218 = shalt.err (!%p215_p10)
}
  0x19   :  { %s219_s6 = scalar_lea.vmem %s285_s15, 1024  ;;  %p224_p12 = scmp.lt.s32.totalorder %s285_s15, %s285_s15 }
  0x1a   :  { %p220_p11 = scmp.ne.s32.totalorder %s285_s15, %s219_s6  ;;  %p225_p13 = scmp.lt.s32.totalorder %s219_s6, %s219_s6 }
  0x1c   :  { %p226_p0 = por %p225_p13, %p224_p12 }
  0x1e   :  { %p227_p1 = pnand %p226_p0, %p220_p11 }
  0x20   :  { %230 = shalt.err (!%p227_p1)
}
  0x21   :  { %s261_s0 = smov 256   ;;  %s262_s7 = smov 16  }
  0x22   :  { %32 = dma.hbm_to_vmem [thread:$0]  %s332_s1, 1024, %s285_s15, [#allocation6], %s261_s0, %s261_s0, %s262_s7  }
  0x23   :  { %253 = dma.done.wait [#allocation3], 32  }
  0x24   :  { %254 = vsyncadd [#allocation3], 4294967264 }
  0x25   :  { %255 = dma.done.wait [#allocation6], 1024  }
  0x26   :  { %256 = vsyncadd [#allocation6], 4294966272  ;;  %v263_v0 = vmov 0.0   ;;  %v43_v1 = vld [vmem:[#allocation5 + $0x8] sm:$0xff]  ;;  %v45_v2 = vld [vmem:[#allocation5 + $0x18] sm:$0xff]  ;;  %vm62_vm0 = vcmask 261120   ;;  %v52_v14 = vlaneseq }
  0x27   :  { %130 = vmatprep.mubr.f32.mxu0 %v263_v0  ;;  %v42_v3 = vld [vmem:[#allocation5] sm:$0xff]  ;;  %v173_v4 = vpack.c.bf16 %v45_v2, %v43_v1  ;;  %v44_v5 = vld [vmem:[#allocation5 + $0x10] sm:$0xff]  ;;  %v47_v6 = vld [vmem:[#allocation5 + $0x28] sm:$0xff]  ;;  %s264_s11 = smov [#allocation7]  }
  0x28   :  { %v49_v7 = vld [vmem:[#allocation5 + $0x38] sm:$0xff]  ;;  %v175_v8 = vpack.c.bf16 %v44_v5, %v42_v3  ;;  %v46_v10 = vld [vmem:[#allocation5 + $0x20] sm:$0xff]  ;;  %v48_v11 = vld [vmem:[#allocation5 + $0x30] sm:$0xff]  ;;  %v53_v15 = vshrl.u32 %v52_v14, 7  ;;  %s161_s12 = sshll.u32 %s264_s11, 4  ;;  %s162_s12 = int_to_ptr.vmem [resolvable:$true] %s161_s12 }
  0x29   :  { %v177_v9 = vpack.c.bf16 %v49_v7, %v47_v6  ;;  %174 = vmatprep.subr.bf16.mxu0 %v173_v4  ;;  %v179_v12 = vpack.c.bf16 %v48_v11, %v46_v10  ;;  %v41_v13 = vld [vmem:[#allocation2] sm:$0x3]  ;;  %s231_s13 = scalar_lea.vmem %s162_s12, 64  ;;  %p236_p3 = scmp.lt.s32.totalorder %s162_s12, %s162_s12 }
  0x2a   :  { %176 = vmatpush1.bf16.msra.mxu0 %v175_v8  ;;  %v54_v16 = vsub.s32 0, %v53_v15  ;;  %v50_v17 = vld [vmem:[%s333_s2] sm:$0x3]  ;;  %v58_v18 = vsub.s32 1, %v53_v15  ;;  %p232_p2 = scmp.ne.s32.totalorder %s162_s12, %s231_s13  ;;  %p237_p4 = scmp.lt.s32.totalorder %s231_s13, %s231_s13 }
  0x2b   :  { %178 = vmatprep.subr.bf16.mxu0 %v177_v9 }
  0x2c   :  { %v55_v19 = vrot.slane %v50_v17, %v54_v16  ;;  %v59_v20 = vrot.slane %v50_v17, %v58_v18  ;;  %p238_p5 = por %p237_p4, %p236_p3 }
  0x2e   :  { %180 = vmatpush1.bf16.msra.mxu0 %v179_v12  ;;  %p239_p6 = pnand %p238_p5, %p232_p2 }
  0x31   :  { %171 = vmatmul.mubr.msk.f32.vlgmr.msra.gmra.mrb[0].mxu0 %vm62_vm0, %v41_v13 }
 0x104   :  { %v132_v21 = vpop.f32.mrb[0].mxu0 }
 0x105   :  { %v133_v22 = vadd.f32 %v132_v21, %v55_v19  ;;  %v134_v23 = vpop.f32.mrb[1].mxu0 }
 0x106   :  { %v135_v24 = vadd.f32 %v134_v23, %v59_v20 }
 0x107   :  { %vm137_vm1 = vcmp.ge.f32.partialorder %v133_v22, 0.0  ;;  %v139_v25 = vmul.f32 0.01, %v133_v22 }
 0x108   :  { %vm138_vm2 = vcmp.ge.f32.partialorder %v135_v24, 0.0  ;;  %v140_v26 = vmul.f32 0.01, %v135_v24 }
 0x109   :  { %v141_v27 = vsel %vm137_vm1, %v133_v22, %v139_v25 }
 0x10a   :  { %v142_v28 = vsel %vm138_vm2, %v135_v24, %v140_v26 }
 0x10b   :  { %v145_v29 = vcombine.low %v141_v27, %v142_v28 }
 0x10d   :  { %172 = vst.sshfl [vmem:[#allocation7] sm:$0x33 pattern:$0x76325410] %v145_v29 }
 0x10e   :  { %242 = shalt.err (!%p239_p6)
}
 0x10f   :  { %s243_s15 = scalar_lea.hbm %s334_s3, 64 }
 0x110   :  { %p244_p7 = scmp.ne.s32.totalorder %s334_s3, %s243_s15  ;;  %p247_p8 = scmp.lt.u32.totalorder %s243_s15, %s334_s3 }
 0x112   :  { %p249_p9 = pnand %p247_p8, %p244_p7 }
 0x114   :  { %252 = shalt.err (!%p249_p9)
}
 0x115   :  { %164 = dma.vmem_to_hbm [thread:$0]  %s162_s12, 64, %s334_s3, [#allocation4]  }
 0x116   :  { %257 = dma.done.wait [#allocation4], 64  }
 0x117   :  { %258 = vsyncadd [#allocation4], 4294967232 }
 0x118   :  { %168 = vsyncpa [#allocation3], 1 }
 0x119   :  { %169 = vsyncpa [#allocation6], 1 }
 0x11a   :  { %170 = vsyncpa [#allocation4], 1 }

</bundles_post_ra>
